<compile_context>
chip_gen: v7x
topology: tpu7x:2x2x1
jax: 0.10.0
libtpu: 0.0.40
codegen_flags: <defaults>
</compile_context>

<pallas_src>
import jax
import jax.numpy as jnp
from jax.experimental import pallas as pl
from jax.experimental.pallas import tpu as pltpu


def value_net_kernel(x_ref, p_ref, o_ref):
    # x_ref: (TB, S)  batch on sublanes, state features on lanes
    # p_ref: (P,  H)  packed params: rows 0..S-1 = W1, row S = b1,
    #                 row S+1 = W2 row, row S+2 = b2 (replicated across lanes)
    # o_ref: (TB, 1)  value column
    TB, S = x_ref.shape
    H = p_ref.shape[1]

    # ---- Hidden layer on the VPU: h = b1 + sum_k x[:, k] * W1[k, :] ----
    h = jnp.broadcast_to(p_ref[S:S + 1, :], (TB, H))          # b1
    for k in range(S):                                        # S tiny (4) -> unrolled
        h = h + x_ref[:, k:k + 1] * p_ref[k:k + 1, :]         # W1[k, :]
    h = jnp.maximum(h, 0.0)                                   # ReLU

    # ---- Output layer: VPU multiply + lane (XLU) reduction + b2 ----
    w2 = p_ref[S + 1:S + 2, :]                                # (1, H)
    b2 = p_ref[S + 2:S + 3, 0:1]                              # (1, 1)
    v = jnp.sum(h * w2, axis=-1, keepdims=True) + b2          # (TB, 1)
    o_ref[...] = v.astype(o_ref.dtype)


def pack_params(w1, b1, w2, b2):
    """Pack (W1, b1, W2, b2) into one (P, H) f32 array (P rounded up to 8)."""
    S, H = w1.shape
    rows = [
        w1.astype(jnp.float32),                                       # rows 0..S-1
        jnp.reshape(b1, (1, H)).astype(jnp.float32),                  # row S
        jnp.reshape(w2, (1, H)).astype(jnp.float32),                  # row S+1
        jnp.broadcast_to(jnp.reshape(b2, (1, 1)).astype(jnp.float32), (1, H)),  # row S+2
    ]
    packed = jnp.concatenate(rows, axis=0)
    p = packed.shape[0]
    p_pad = ((p + 7) // 8) * 8
    if p_pad != p:
        packed = jnp.pad(packed, ((0, p_pad - p), (0, 0)))
    return packed


def value_net_forward(x, params, *, tile_b=256):
    B, S = x.shape
    P, H = params.shape

    def cost(rows):
        return pl.CostEstimate(
            flops=2 * rows * S * H + 2 * rows * H,
            transcendentals=0,
            bytes_accessed=4 * (rows * S + P * H + rows))

    if B <= tile_b:
        # Small batch (single env step): one un-gridded call, whole arrays in VMEM.
        return pl.pallas_call(
            value_net_kernel,
            out_shape=jax.ShapeDtypeStruct((B, 1), jnp.float32),
            in_specs=[
                pl.BlockSpec(memory_space=pltpu.MemorySpace.VMEM),  # x
                pl.BlockSpec(memory_space=pltpu.MemorySpace.VMEM),  # packed params
            ],
            out_specs=pl.BlockSpec(memory_space=pltpu.MemorySpace.VMEM),
            cost_estimate=cost(B),
        )(x, params)

    # Large batch (rollout / many env states): tile the batch, keep params resident
    # (constant index_map -> DMA'd once), split batch tiles across cores.
    assert tile_b % 8 == 0, "batch tile must be a multiple of 8 sublanes"
    nb = pl.cdiv(B, tile_b)
    b_pad = nb * tile_b
    if b_pad != B:
        x = jnp.pad(x, ((0, b_pad - B), (0, 0)))
    out = pl.pallas_call(
        value_net_kernel,
        out_shape=jax.ShapeDtypeStruct((b_pad, 1), jnp.float32),
        grid=(nb,),
        in_specs=[
            pl.BlockSpec((tile_b, S), lambda i: (i, 0)),   # x streams per tile
            pl.BlockSpec((P, H), lambda i: (0, 0)),        # params resident
        ],
        out_specs=pl.BlockSpec((tile_b, 1), lambda i: (i, 0)),
        compiler_params=pltpu.CompilerParams(dimension_semantics=("parallel",)),
        cost_estimate=cost(b_pad),
    )(x, params)
    return out[:B] if b_pad != B else out


def init_params(key, state_dim, hidden_dim):
    # Deterministic PyTorch-style uniform fan-in init, synthetic weights.
    k1, k2, k3, k4 = jax.random.split(key, 4)
    bound1 = 1.0 / jnp.sqrt(state_dim)
    bound2 = 1.0 / jnp.sqrt(hidden_dim)
    w1 = jax.random.uniform(k1, (state_dim, hidden_dim), jnp.float32, -bound1, bound1)
    b1 = jax.random.uniform(k2, (hidden_dim,), jnp.float32, -bound1, bound1)
    w2 = jax.random.uniform(k3, (hidden_dim, 1), jnp.float32, -bound2, bound2)
    b2 = jax.random.uniform(k4, (1,), jnp.float32, -bound2, bound2)
    return w1, b1, w2, b2


if __name__ == "__main__":
    # CartPole-like sizes: state_dim=4, hidden_dim=32, batch=8.
    B, STATE_DIM, HIDDEN_DIM = 8, 4, 32

    key = jax.random.PRNGKey(0)
    kx, kp, kx2 = jax.random.split(key, 3)
    x = jax.random.normal(kx, (B, STATE_DIM), dtype=jnp.float32)
    w1, b1, w2, b2 = init_params(kp, STATE_DIM, HIDDEN_DIM)
    params = pack_params(w1, b1, w2, b2)

    def ref_fn(xx):
        return jnp.maximum(xx @ w1 + b1.reshape(1, -1), 0.0) @ w2 + b2.reshape(1, 1)

    # Path 1: small-batch (single env step) un-gridded call.
    out = jax.block_until_ready(value_net_forward(x, params))
    assert out.shape == (B, 1)
    assert jnp.allclose(out, ref_fn(x), atol=1e-5, rtol=1e-5)

    # Path 2: rollout-batch gridded call (params resident, batch tiles in parallel).
    B2 = 48
    x2 = jax.random.normal(kx2, (B2, STATE_DIM), dtype=jnp.float32)
    out2 = jax.block_until_ready(value_net_forward(x2, params, tile_b=16))
    assert out2.shape == (B2, 1)
    assert jnp.allclose(out2, ref_fn(x2), atol=1e-5, rtol=1e-5)

    print("KERNEL_OK")
</pallas_src>

<mosaic_0001>
module attributes {stable_mosaic.version = 11 : i64} {
  func.func @value_net_kernel(%arg0: memref<8x4xf32, #tpu.memory_space<vmem>>, %arg1: memref<8x32xf32, #tpu.memory_space<vmem>>, %arg2: memref<8x1xf32, #tpu.memory_space<vmem>>) attributes {dimension_semantics = [], scalar_prefetch = 0 : i64, scratch_operands = 0 : i64, tpu.core_type = #tpu.core_type<tc>} {
    %c4 = arith.constant 4 : index
    %c0 = arith.constant 0 : index
    %0 = vector.load %arg1[%c4, %c0] : memref<8x32xf32, #tpu.memory_space<vmem>>, vector<1x32xf32>
    %1 = vector.shape_cast %0 : vector<1x32xf32> to vector<1x32xf32>
    %2 = vector.broadcast %1 : vector<1x32xf32> to vector<8x32xf32>
    %c0_0 = arith.constant 0 : index
    %c0_1 = arith.constant 0 : index
    %3 = vector.load %arg0[%c0_0, %c0_1] : memref<8x4xf32, #tpu.memory_space<vmem>>, vector<8x1xf32>
    %c0_2 = arith.constant 0 : index
    %c0_3 = arith.constant 0 : index
    %4 = vector.load %arg1[%c0_2, %c0_3] : memref<8x32xf32, #tpu.memory_space<vmem>>, vector<1x32xf32>
    %5 = vector.broadcast %3 : vector<8x1xf32> to vector<8x32xf32>
    %6 = vector.broadcast %4 : vector<1x32xf32> to vector<8x32xf32>
    %7 = arith.mulf %5, %6 : vector<8x32xf32>
    %8 = arith.addf %2, %7 : vector<8x32xf32>
    %c0_4 = arith.constant 0 : index
    %c1 = arith.constant 1 : index
    %9 = vector.load %arg0[%c0_4, %c1] : memref<8x4xf32, #tpu.memory_space<vmem>>, vector<8x1xf32>
    %c1_5 = arith.constant 1 : index
    %c0_6 = arith.constant 0 : index
    %10 = vector.load %arg1[%c1_5, %c0_6] : memref<8x32xf32, #tpu.memory_space<vmem>>, vector<1x32xf32>
    %11 = vector.broadcast %9 : vector<8x1xf32> to vector<8x32xf32>
    %12 = vector.broadcast %10 : vector<1x32xf32> to vector<8x32xf32>
    %13 = arith.mulf %11, %12 : vector<8x32xf32>
    %14 = arith.addf %8, %13 : vector<8x32xf32>
    %c0_7 = arith.constant 0 : index
    %c2 = arith.constant 2 : index
    %15 = vector.load %arg0[%c0_7, %c2] : memref<8x4xf32, #tpu.memory_space<vmem>>, vector<8x1xf32>
    %c2_8 = arith.constant 2 : index
    %c0_9 = arith.constant 0 : index
    %16 = vector.load %arg1[%c2_8, %c0_9] : memref<8x32xf32, #tpu.memory_space<vmem>>, vector<1x32xf32>
    %17 = vector.broadcast %15 : vector<8x1xf32> to vector<8x32xf32>
    %18 = vector.broadcast %16 : vector<1x32xf32> to vector<8x32xf32>
    %19 = arith.mulf %17, %18 : vector<8x32xf32>
    %20 = arith.addf %14, %19 : vector<8x32xf32>
    %c0_10 = arith.constant 0 : index
    %c3 = arith.constant 3 : index
    %21 = vector.load %arg0[%c0_10, %c3] : memref<8x4xf32, #tpu.memory_space<vmem>>, vector<8x1xf32>
    %c3_11 = arith.constant 3 : index
    %c0_12 = arith.constant 0 : index
    %22 = vector.load %arg1[%c3_11, %c0_12] : memref<8x32xf32, #tpu.memory_space<vmem>>, vector<1x32xf32>
    %23 = vector.broadcast %21 : vector<8x1xf32> to vector<8x32xf32>
    %24 = vector.broadcast %22 : vector<1x32xf32> to vector<8x32xf32>
    %25 = arith.mulf %23, %24 : vector<8x32xf32>
    %26 = arith.addf %20, %25 : vector<8x32xf32>
    %cst = arith.constant 0.000000e+00 : f32
    %27 = vector.broadcast %cst : f32 to vector<8x32xf32>
    %28 = arith.maximumf %26, %27 : vector<8x32xf32>
    %c5 = arith.constant 5 : index
    %c0_13 = arith.constant 0 : index
    %29 = vector.load %arg1[%c5, %c0_13] : memref<8x32xf32, #tpu.memory_space<vmem>>, vector<1x32xf32>
    %c6 = arith.constant 6 : index
    %c0_14 = arith.constant 0 : index
    %30 = vector.load %arg1[%c6, %c0_14] : memref<8x32xf32, #tpu.memory_space<vmem>>, vector<1x1xf32>
    %31 = vector.broadcast %29 : vector<1x32xf32> to vector<8x32xf32>
    %32 = arith.mulf %28, %31 : vector<8x32xf32>
    %cst_15 = arith.constant dense<0.000000e+00> : vector<8xf32>
    %33 = vector.multi_reduction <add>, %32, %cst_15 [1] : vector<8x32xf32> to vector<8xf32>
    %34 = vector.shape_cast %33 : vector<8xf32> to vector<8x1xf32>
    %35 = vector.broadcast %30 : vector<1x1xf32> to vector<8x1xf32>
    %36 = arith.addf %34, %35 : vector<8x1xf32>
    %c0_16 = arith.constant 0 : index
    %c0_17 = arith.constant 0 : index
    %37 = vector.load %arg2[%c0_16, %c0_17] : memref<8x1xf32, #tpu.memory_space<vmem>>, vector<8x1xf32>
    tpu.vector_store %arg2[%c0_16, %c0_17], %36 {strides = array<i32>} : memref<8x1xf32, #tpu.memory_space<vmem>>, vector<8x1xf32>,
    return
  }
}

</mosaic_0001>

<bundles_post_ra>
// kernel: tpu_custom_call.1
= control target key start
LH: loop header
LB: loop body
LE: loop exit
PB: predicated region body
PF: predicated region fallthrough
CT: control target
= control target key end

     0   :  { %v101_v0 = vmov 0   ;;  %v102_v2 = vmov 2   ;;  %v103_v3 = vmov 1   ;;  %v104_v4 = vmov 3   ;;  %s147_s0 = inlined_call_operand.vmem [shape: f32[8,4], index: 0, kind: input, shape index: {}]   ;;  %s148_s1 = inlined_call_operand.vmem [shape: f32[8,32], index: 1, kind: input, shape index: {}]   ;;  %s149_s2 = inlined_call_operand.vmem [shape: f32[8,1], index: 2, kind: output, shape index: {}]  }
   0x1   :  { %96 = vset.pattern.permute.xlu0 %v101_v0  ;;  %v16_v1 = vld [vmem:[%s147_s0] sm:$0xff]  ;;  %98 = vset.pattern.permute.xlu1 %v102_v2  ;;  %vm70_vm0 = vcmask 261120   ;;  %vm79_vm1 = vcmask 7168  }
   0x2   :  { %20 = vperm.xlu0 %96, %v16_v1   ;;  %42 = vperm.xlu1 %98, %v16_v1   ;;  %v86_v5 = vld [vmem:[%s148_s1] ss:$0 sm:$0xff]  ;;  %v85_v9 = vld [vmem:[%s148_s1 + $0x4] ss:$0 sm:$0xff]  ;;  %v87_v10 = vld [vmem:[%s148_s1 + $0x1] ss:$0 sm:$0xff] }
   0x3   :  { %v88_v11 = vld [vmem:[%s148_s1 + $0x2] ss:$0 sm:$0xff]  ;;  %v89_v13 = vld [vmem:[%s148_s1 + $0x3] ss:$0 sm:$0xff]  ;;  %v90_v22 = vld [vmem:[%s148_s1 + $0x5] ss:$0 sm:$0xff] }
   0x4   :  { %v91_v26 = vld [vmem:[%s148_s1 + $0x6] ss:$0 sm:$0xff] }
   0x6   :  { %97 = vset.pattern.permute.xlu0 %v103_v3  ;;  %99 = vset.pattern.permute.xlu1 %v104_v4 }
   0x7   :  { %31 = vperm.xlu0 %97, %v16_v1   ;;  %53 = vperm.xlu1 %99, %v16_v1  }
   0xb   :  { %100 = vset.pattern.permute.xlu0 %v104_v4 }
  0x81   :  { %v21_v6 = vpop.permute.xlu0 %20  ;;  %v43_v7 = vpop.permute.xlu1 %42 }
  0x82   :  { %v27_v8 = vmul.f32 %v86_v5, %v21_v6  ;;  %v49_v17 = vmul.f32 %v88_v11, %v43_v7 }
  0x84   :  { %v28_v15 = vadd.f32 %v85_v9, %v27_v8 }
  0x86   :  { %v32_v12 = vpop.permute.xlu0 %31  ;;  %v54_v14 = vpop.permute.xlu1 %53 }
  0x87   :  { %v38_v16 = vmul.f32 %v87_v10, %v32_v12  ;;  %v60_v19 = vmul.f32 %v89_v13, %v54_v14 }
  0x89   :  { %v39_v18 = vadd.f32 %v38_v16, %v28_v15 }
  0x8b   :  { %v50_v20 = vadd.f32 %v49_v17, %v39_v18 }
  0x8d   :  { %v61_v21 = vadd.f32 %v60_v19, %v50_v20 }
  0x8f   :  { %v62_v23 = vmax.f32 %v61_v21, 0.0 }
  0x91   :  { %v69_v24 = vmul.f32 %v90_v22, %v62_v23 }
  0x93   :  { %v71_v25 = vsel %vm70_vm0, %v69_v24, 0.0 }
  0x94   :  { %72 = vadd.xlane.f32.xlu1 %v71_v25 }
 0x121   :  { %v73_v27 = vpop.xlane.xlu1 %72 }
 0x122   :  { %v78_v28 = vadd.f32 %v91_v26, %v73_v27 }
 0x124   :  { %80 = vst.msk [vmem:[%s149_s2] sm:$0xff] %vm79_vm1, %v78_v28 }

</bundles_post_ra>
